<compile_context>
chip_gen: v5e
topology: v5e:2x2
jax: 0.10.0
libtpu: 0.0.40
codegen_flags: <defaults>
</compile_context>

<pallas_src>
import functools

import jax
import jax.numpy as jnp
from jax.experimental import pallas as pl
from jax.experimental.pallas import tpu as pltpu


def _round_up(x, m):
    return ((x + m - 1) // m) * m


def _pick_tile(dim, cap):
    """Largest tile <= cap that divides dim (128-aligned), else the full dim."""
    if dim <= cap:
        return dim
    for t in (cap, 1024, 768, 512, 384, 256, 128):
        if t <= cap and dim % t == 0:
            return t
    return dim


@functools.lru_cache(maxsize=None)
def _vmem_budget():
    """Per-generation VMEM budget (bytes): ~70% of physical, capped at 96 MiB.

    v7x: 64 MiB physical -> ~44 MiB budget; v5e/v6e: 128 MiB -> ~90 MiB.
    """
    phys = 64 << 20
    try:
        info = pltpu.get_tpu_info()
        phys = int(getattr(info, "vmem_capacity_bytes", phys))
    except Exception:
        pass
    return min(int(phys * 0.70), 96 << 20)


# ----------------------------- Pallas kernels ------------------------------

def _make_mm_kernel(relu, with_res, single_k):
    """Tiled bf16 matmul + fused bias [+ residual] [+ ReLU] epilogue.

    single_k=True: whole K fits one block -> no accumulator scratch at all.
    BN scale is pre-folded into the weights, so the epilogue is add-only.
    """

    def kernel(*refs):
        if with_res:
            a_ref, b_ref, t_ref, r_ref = refs[:4]
            rest = refs[4:]
        else:
            a_ref, b_ref, t_ref = refs[:3]
            r_ref = None
            rest = refs[3:]

        if single_k:
            (o_ref,) = rest
            y = jnp.dot(a_ref[...], b_ref[...],
                        preferred_element_type=jnp.float32)
            y = y + t_ref[...]
            if with_res:
                y = y + r_ref[...].astype(jnp.float32)
            if relu:
                y = jnp.maximum(y, 0.0)
            o_ref[...] = y.astype(o_ref.dtype)
        else:
            o_ref, acc_ref = rest
            k = pl.program_id(2)

            @pl.when(k == 0)
            def _init():
                acc_ref[...] = jnp.zeros_like(acc_ref)

            acc_ref[...] += jnp.dot(a_ref[...], b_ref[...],
                                    preferred_element_type=jnp.float32)

            @pl.when(k == pl.num_programs(2) - 1)
            def _finalize():
                y = acc_ref[...] + t_ref[...]
                if with_res:
                    y = y + r_ref[...].astype(jnp.float32)
                if relu:
                    y = jnp.maximum(y, 0.0)
                o_ref[...] = y.astype(o_ref.dtype)

    return kernel


def _maxpool_kernel(x0_ref, x1_ref, x2_ref, o_ref):
    # x?_ref: (1, 2, A, Wo*C) -- W-shifted stride-2 views with H split into
    #         (parity, row-pair); o_ref: (1, Ho, Wo*C).  Lane-dense last dim.
    ho = o_ref.shape[1]
    m = None
    for xr in (x0_ref, x1_ref, x2_ref):
        x = xr[0]                                          # (2, A, WoC)
        for tap in (x[0, 0:ho], x[1, 0:ho], x[0, 1:ho + 1]):   # 3 H-taps
            m = tap if m is None else jnp.maximum(m, tap)
    o_ref[0] = m


def _make_mean_kernel(hw_total, thw, need_mask):
    inv = 1.0 / float(hw_total)

    def kernel(x_ref, o_ref, acc_ref):
        j = pl.program_id(1)

        @pl.when(j == 0)
        def _init():
            acc_ref[...] = jnp.zeros_like(acc_ref)

        x = x_ref[...].astype(jnp.float32)                  # (1, THW, C)
        if need_mask:
            idx = jax.lax.broadcasted_iota(jnp.int32, x.shape, 1) + j * thw
            x = jnp.where(idx < hw_total, x, 0.0)
        acc_ref[...] += jnp.sum(x, axis=1, keepdims=True)

        @pl.when(j == pl.num_programs(1) - 1)
        def _finalize():
            o_ref[...] = acc_ref[...] * inv

    return kernel


# ----------------------------- Pallas wrappers ------------------------------

def _mm_vmem_bytes(tm, tn, tk, with_res, kgrid):
    a = 2 * tm * tk * 2                      # bf16 A, double-buffered
    b = 2 * tk * tn * 2                      # bf16 B
    o = 2 * tm * tn * 2                      # bf16 out
    r = 2 * tm * tn * 2 if with_res else 0   # bf16 residual
    acc = tm * tn * 4 if kgrid > 1 else 0    # f32 accumulator scratch
    return a + b + o + r + acc + 2 * tn * 4


def _matmul_bn_fused(a, b, bias, residual, *, relu):
    """a: (M,K) bf16, b: (K,N) bf16 (BN scale folded in), bias: (1,N) f32,
    residual: (M,N) bf16 | None.  Returns (M,N) bf16."""
    M, K = a.shape
    _, N = b.shape
    with_res = residual is not None

    TN = _pick_tile(N, 512)
    TK = _pick_tile(K, 1024)
    kgrid = K // TK

    budget = _vmem_budget()
    if M <= 16:
        TM = _round_up(M, 8)                        # single tiny block
    else:
        cap = 1024 if M >= 1024 else 512
        # keep >= 2 parallel (i, j) tiles so both v7x TensorCores get work
        if (N // TN) == 1 and M > 256:
            cap = min(cap, max(256, _round_up(pl.cdiv(M, 2), 256)))
        while cap > 128 and _mm_vmem_bytes(cap, TN, TK, with_res, kgrid) > budget:
            cap //= 2
        TM = min(_round_up(M, 16), cap)             # bf16 sublane packing

    grid = (pl.cdiv(M, TM), N // TN, kgrid)

    in_specs = [pl.BlockSpec((TM, TK), lambda i, j, k: (i, k)),
                pl.BlockSpec((TK, TN), lambda i, j, k: (k, j)),
                pl.BlockSpec((1, TN), lambda i, j, k: (0, j))]
    args = [a, b, bias]
    if with_res:
        in_specs.append(pl.BlockSpec((TM, TN), lambda i, j, k: (i, j)))
        args.append(residual)

    scratch = [] if kgrid == 1 else [pltpu.VMEM((TM, TN), jnp.float32)]

    bytes_accessed = (a.size * 2 + b.size * 2 + M * N * 2 + N * 4
                      + (M * N * 2 if with_res else 0))
    return pl.pallas_call(
        _make_mm_kernel(relu, with_res, kgrid == 1),
        out_shape=jax.ShapeDtypeStruct((M, N), jnp.bfloat16),
        grid=grid,
        in_specs=in_specs,
        out_specs=pl.BlockSpec((TM, TN), lambda i, j, k: (i, j)),
        scratch_shapes=scratch,
        compiler_params=pltpu.CompilerParams(
            dimension_semantics=("parallel", "parallel", "arbitrary"),
            vmem_limit_bytes=budget),
        cost_estimate=pl.CostEstimate(flops=2 * M * N * K, transcendentals=0,
                                      bytes_accessed=int(bytes_accessed)),
    )(*args)


@functools.partial(jax.jit, static_argnames=("stride", "pad", "relu"))
def conv2d_bn(x, w, scale, bias, residual=None, *, stride, pad, relu):
    """conv (im2col + fused Pallas matmul) + BN [+ residual] [+ ReLU].

    x: NHWC bf16, w: (KH,KW,Cin,Cout) f32, scale/bias: (1,Cout) f32,
    residual: NHWC bf16 | None.  BN scale is folded into the weights here.
    """
    N, H, W, Cin = x.shape
    KH, KW, _, Cout = w.shape
    x = x.astype(jnp.bfloat16)

    if KH == 1 and KW == 1 and pad == 0:
        xs = x if stride == 1 else x[:, ::stride, ::stride, :]
        Ho, Wo = xs.shape[1], xs.shape[2]
        patches = xs.reshape(N * Ho * Wo, Cin)
    else:
        # TODO(synk): implicit in-kernel im2col would avoid this HBM round trip.
        xpad = jnp.pad(x, ((0, 0), (pad, pad), (pad, pad), (0, 0)))
        Hp, Wp = H + 2 * pad, W + 2 * pad
        Ho = (Hp - KH) // stride + 1
        Wo = (Wp - KW) // stride + 1
        cols = []
        for i in range(KH):
            for j in range(KW):
                cols.append(xpad[:, i:i + stride * (Ho - 1) + 1:stride,
                                    j:j + stride * (Wo - 1) + 1:stride, :])
        patches = jnp.concatenate(cols, axis=-1).reshape(
            N * Ho * Wo, KH * KW * Cin)

    # fold BN scale into the weights (f32) before the bf16 cast
    wmat = (w.reshape(KH * KW * Cin, Cout) * scale).astype(jnp.bfloat16)
    res2d = (None if residual is None
             else residual.reshape(N * Ho * Wo, Cout).astype(jnp.bfloat16))
    out2d = _matmul_bn_fused(patches, wmat, bias, res2d, relu=relu)
    return out2d.reshape(N, Ho, Wo, Cout)


@jax.jit
def maxpool_3x3_s2(x):
    """3x3 / stride-2 / pad-1 max pool, NHWC bf16, lane-dense Pallas layout."""
    N, H, W, C = x.shape
    x = x.astype(jnp.bfloat16)
    xp = jnp.pad(x, ((0, 0), (1, 1), (1, 1), (0, 0)),
                 constant_values=-jnp.inf)
    Hp, Wp = H + 2, W + 2
    Ho = (Hp - 3) // 2 + 1
    Wo = (Wp - 3) // 2 + 1
    if Hp % 2:                      # make H splittable into (row-pair, parity)
        xp = jnp.pad(xp, ((0, 0), (0, 1), (0, 0), (0, 0)),
                     constant_values=-jnp.inf)
        Hp += 1
    A = Hp // 2
    WoC = Wo * C

    # Three W-shifted stride-2 views (only ~1.5x the feature map in HBM);
    # (Wo, C) collapsed into one lane-dense last dim, parity kept major.
    views = []
    for j in range(3):
        v = jax.lax.slice(xp, (0, 0, j, 0),
                          (N, Hp, j + 2 * (Wo - 1) + 1, C), (1, 1, 2, 1))
        v = v.reshape(N, A, 2, WoC)
        views.append(jnp.transpose(v, (0, 2, 1, 3)))        # (N, 2, A, WoC)

    # TODO(synk): tile over Ho as well (overlapping row windows) for large H.
    out = pl.pallas_call(
        _maxpool_kernel,
        out_shape=jax.ShapeDtypeStruct((N, Ho, WoC), jnp.bfloat16),
        grid=(N,),
        in_specs=[pl.BlockSpec((1, 2, A, WoC), lambda n: (n, 0, 0, 0))] * 3,
        out_specs=pl.BlockSpec((1, Ho, WoC), lambda n: (n, 0, 0)),
        compiler_params=pltpu.CompilerParams(
            dimension_semantics=("parallel",),
            vmem_limit_bytes=_vmem_budget()),
    )(*views)
    return out.reshape(N, Ho, Wo, C)


@jax.jit
def pallas_mean_hw(x):
    """x: (N, HW, C) bf16 -> (N, 1, C) f32, mean over HW (tiled + accumulated)."""
    N, HW, C = x.shape
    if HW <= 2048:
        THW = HW
    else:
        THW = next((t for t in (2048, 1024, 512, 256, 128) if HW % t == 0), 512)
    nhw = pl.cdiv(HW, THW)
    need_mask = (HW % THW) != 0
    return pl.pallas_call(
        _make_mean_kernel(HW, THW, need_mask),
        out_shape=jax.ShapeDtypeStruct((N, 1, C), jnp.float32),
        grid=(N, nhw),
        in_specs=[pl.BlockSpec((1, THW, C), lambda n, j: (n, j, 0))],
        out_specs=pl.BlockSpec((1, 1, C), lambda n, j: (n, 0, 0)),
        scratch_shapes=[pltpu.VMEM((1, 1, C), jnp.float32)],
        compiler_params=pltpu.CompilerParams(
            dimension_semantics=("parallel", "arbitrary"),
            vmem_limit_bytes=_vmem_budget()),
    )(x)


# ----------------------------- NN building blocks ---------------------------

def bottleneck(x, p):
    s1, b1 = p["bn1"]
    s2, b2 = p["bn2"]
    s3, b3 = p["bn3"]
    if "wd" in p:
        sd, bd = p["bnd"]
        identity = conv2d_bn(x, p["wd"], sd, bd,
                             stride=p["stride"], pad=0, relu=False)
    else:
        identity = x
    out = conv2d_bn(x, p["w1"], s1, b1, stride=1, pad=0, relu=True)
    out = conv2d_bn(out, p["w2"], s2, b2, stride=p["stride"], pad=1, relu=True)
    # conv3 + BN + residual add + ReLU fused into one kernel.
    out = conv2d_bn(out, p["w3"], s3, b3, identity,
                    stride=1, pad=0, relu=True)
    return out


# ----------------------------- parameter init -------------------------------

def conv_init(key, kh, kw, cin, cout, scale=1.0):
    std = scale * (2.0 / (kh * kw * cin)) ** 0.5
    return jax.random.normal(key, (kh, kw, cin, cout), jnp.float32) * std


def bn_init(key, c, eps=1e-5):
    k1, k2, k3, k4 = jax.random.split(key, 4)
    gamma = 1.0 + 0.1 * jax.random.normal(k1, (c,), jnp.float32)
    beta = 0.1 * jax.random.normal(k2, (c,), jnp.float32)
    mean = 0.1 * jax.random.normal(k3, (c,), jnp.float32)
    var = 1.0 + 0.1 * jax.random.uniform(k4, (c,), jnp.float32)
    scale = gamma / jnp.sqrt(var + eps)
    bias = beta - mean * scale
    return scale.reshape(1, c), bias.reshape(1, c)


def build_params(key, base=8, layers=(3, 4, 23, 3)):
    """ResNet-101 topology ([3,4,23,3] bottlenecks), scaled-down channel width."""
    expansion = 4
    params = {}
    key, k = jax.random.split(key)
    params["conv1"] = conv_init(k, 7, 7, 3, base)
    key, k = jax.random.split(key)
    params["bn1"] = bn_init(k, base)

    inplanes = base
    plan = [(base, layers[0], 1), (base * 2, layers[1], 2),
            (base * 4, layers[2], 2), (base * 8, layers[3], 2)]
    layer_params = []
    for planes, blocks, stride in plan:
        blist = []
        for b in range(blocks):
            s = stride if b == 0 else 1
            down = (b == 0) and (s != 1 or inplanes != planes * expansion)
            p = {"stride": s}
            key, k = jax.random.split(key)
            p["w1"] = conv_init(k, 1, 1, inplanes, planes)
            key, k = jax.random.split(key)
            p["bn1"] = bn_init(k, planes)
            key, k = jax.random.split(key)
            p["w2"] = conv_init(k, 3, 3, planes, planes)
            key, k = jax.random.split(key)
            p["bn2"] = bn_init(k, planes)
            key, k = jax.random.split(key)
            p["w3"] = conv_init(k, 1, 1, planes, planes * expansion, scale=0.5)
            key, k = jax.random.split(key)
            p["bn3"] = bn_init(k, planes * expansion)
            if down:
                key, k = jax.random.split(key)
                p["wd"] = conv_init(k, 1, 1, inplanes, planes * expansion)
                key, k = jax.random.split(key)
                p["bnd"] = bn_init(k, planes * expansion)
            blist.append(p)
            inplanes = planes * expansion
        layer_params.append(blist)
    params["layers"] = layer_params
    return params


# ----------------------------- forward pass ----------------------------------

def resnet101_forward(x_nchw, params):
    """Mirrors resnet101.forward: returns (feature3, feature4, tail) in NCHW."""
    # NCHW -> NHWC, bf16 activations end-to-end
    x = jnp.transpose(x_nchw, (0, 2, 3, 1)).astype(jnp.bfloat16)
    s1, b1 = params["bn1"]
    x = conv2d_bn(x, params["conv1"], s1, b1, stride=2, pad=3, relu=True)
    x = maxpool_3x3_s2(x)

    feats = []
    for blist in params["layers"]:                                # layer1..4
        for p in blist:
            x = bottleneck(x, p)
        feats.append(x)

    feature3, feature4 = feats[2], feats[3]

    # tail = mean over W (dim 3) keepdim, then mean over H (dim 2) keepdim
    N, H, W, C = feature4.shape
    tail = pallas_mean_hw(feature4.reshape(N, H * W, C))          # (N, 1, C) f32

    f3 = jnp.transpose(feature3, (0, 3, 1, 2)).astype(jnp.float32)   # NCHW
    f4 = jnp.transpose(feature4, (0, 3, 1, 2)).astype(jnp.float32)
    tail = jnp.transpose(tail.reshape(N, 1, 1, C), (0, 3, 1, 2))     # (N, C, 1, 1)
    return f3, f4, tail


# ----------------------------- main -------------------------------------------

if __name__ == "__main__":
    key = jax.random.PRNGKey(0)
    pkey, xkey = jax.random.split(key)

    # small-width ResNet-101 backbone (block counts [3,4,23,3], base width 8)
    params = build_params(pkey, base=8, layers=(3, 4, 23, 3))

    # input image batch, NCHW like PyTorch
    x = jax.random.normal(xkey, (2, 3, 32, 32), jnp.float32)

    f3, f4, tail = resnet101_forward(x, params)
    jax.block_until_ready((f3, f4, tail))

    assert f3.shape == (2, 128, 2, 2), f3.shape      # feature3: stride 16
    assert f4.shape == (2, 256, 1, 1), f4.shape      # feature4: stride 32
    assert tail.shape == (2, 256, 1, 1), tail.shape  # global avg of feature4
    assert jnp.all(jnp.isfinite(f4)) and jnp.all(jnp.isfinite(tail))

    print("KERNEL_OK")
</pallas_src>

<mosaic_0001>
module attributes {stable_mosaic.version = 11 : i64} {
  func.func @kernel(%arg0: i32, %arg1: i32, %arg2: i32, %arg3: memref<256x147xbf16, #tpu.memory_space<vmem>>, %arg4: memref<147x8xbf16, #tpu.memory_space<vmem>>, %arg5: memref<1x8xf32, #tpu.memory_space<vmem>>, %arg6: memref<256x8xbf16, #tpu.memory_space<vmem>>) attributes {dimension_semantics = [#tpu.dimension_semantics<parallel>, #tpu.dimension_semantics<parallel>, #tpu.dimension_semantics<arbitrary>], iteration_bounds = array<i64: 2, 1, 1>, scalar_prefetch = 0 : i64, scratch_operands = 0 : i64, tpu.core_type = #tpu.core_type<tc>, window_params = [{transform_indices = @transform_0, window_bounds = array<i64: 256, 147>}, {transform_indices = @transform_1, window_bounds = array<i64: 147, 8>}, {transform_indices = @transform_2, window_bounds = array<i64: 1, 8>}, {transform_indices = @transform_3, window_bounds = array<i64: 256, 8>}]} {
    %c0 = arith.constant 0 : index
    %c0_0 = arith.constant 0 : index
    %0 = vector.load %arg3[%c0, %c0_0] : memref<256x147xbf16, #tpu.memory_space<vmem>>, vector<256x147xbf16>
    %c0_1 = arith.constant 0 : index
    %c0_2 = arith.constant 0 : index
    %1 = vector.load %arg4[%c0_1, %c0_2] : memref<147x8xbf16, #tpu.memory_space<vmem>>, vector<147x8xbf16>
    %cst = arith.constant dense<0.000000e+00> : vector<256x8xf32>
    %2 = tpu.matmul %0, %1, %cst {dimension_numbers = #tpu.dot_dimension_numbers<[1], [0], [0], [1], [0, 0, 1, 1], [], []>} : vector<256x147xbf16>, vector<147x8xbf16>, vector<256x8xf32> -> vector<256x8xf32>
    %c0_3 = arith.constant 0 : index
    %c0_4 = arith.constant 0 : index
    %3 = vector.load %arg5[%c0_3, %c0_4] : memref<1x8xf32, #tpu.memory_space<vmem>>, vector<1x8xf32>
    %4 = vector.broadcast %3 : vector<1x8xf32> to vector<256x8xf32>
    %5 = arith.addf %2, %4 : vector<256x8xf32>
    %cst_5 = arith.constant 0.000000e+00 : f32
    %6 = vector.broadcast %cst_5 : f32 to vector<256x8xf32>
    %7 = arith.maximumf %5, %6 : vector<256x8xf32>
    %8 = arith.truncf %7 : vector<256x8xf32> to vector<256x8xbf16>
    %c0_6 = arith.constant 0 : index
    %c0_7 = arith.constant 0 : index
    %9 = vector.load %arg6[%c0_6, %c0_7] : memref<256x8xbf16, #tpu.memory_space<vmem>>, vector<256x8xbf16>
    tpu.vector_store %arg6[%c0_6, %c0_7], %8 {strides = array<i32>} : memref<256x8xbf16, #tpu.memory_space<vmem>>, vector<256x8xbf16>,
    return
  }
  func.func @transform_0(%arg0: i32, %arg1: i32, %arg2: i32) -> (i32, i32) {
    %c0_i32 = arith.constant 0 : i32
    return %arg0, %arg2 : i32, i32
  }
  func.func @transform_1(%arg0: i32, %arg1: i32, %arg2: i32) -> (i32, i32) {
    %c0_i32 = arith.constant 0 : i32
    return %arg2, %arg1 : i32, i32
  }
  func.func @transform_2(%arg0: i32, %arg1: i32, %arg2: i32) -> (i32, i32) {
    %c0_i32 = arith.constant 0 : i32
    %c0_i32_0 = arith.constant 0 : i32
    return %c0_i32, %arg1 : i32, i32
  }
  func.func @transform_3(%arg0: i32, %arg1: i32, %arg2: i32) -> (i32, i32) {
    %c0_i32 = arith.constant 0 : i32
    return %arg0, %arg1 : i32, i32
  }
}

</mosaic_0001>

<bundles_post_ra>
// kernel: conv2d_bn.1
= control target key start
LH: loop header
LB: loop body
LE: loop exit
PB: predicated region body
PF: predicated region fallthrough
CT: control target
= control target key end

     0   :  { %s1286_s12 = smov 0   ;;  %s1288_s13 = smov 0   ;;  %s1544_s0 = inlined_call_operand.vmem [shape: bf16[512,147], index: 0, kind: input, shape index: {}]   ;;  %s1545_s1 = inlined_call_operand.vmem [shape: bf16[147,8], index: 1, kind: input, shape index: {}]   ;;  %s1546_s2 = inlined_call_operand.vmem [shape: f32[1,8], index: 2, kind: input, shape index: {}]   ;;  %s1547_s3 = inlined_call_operand.vmem [shape: bf16[512,8], index: 3, kind: output, shape index: {}]  }
   0x1   :  { %s1290_s14 = smov 0  }
   0x2 LB: > { %s32_s15 = sadd.s32 1, %s1259_s13  ;;  %p975_p0 = scmp.ge.s32.totalorder %s1263_s14, 1  ;;  %s1263_s14 = sphi %s1290_s14, %s13_s14   ;;  %s1259_s13 = sphi %s1288_s13, %s1549_s13   ;;  %s1255_s12 = sphi %s1286_s12, %s1548_s12  }
   0x3   : > { %p34_p1 = scmp.ge.s32.totalorder %s32_s15, 2  ;;  %p191_p2 = scmp.lt.s32.totalorder %s1263_s14, 3 }
   0x5   : > { %s1551_s15 = smov (%p34_p1, %s32_s15), 0  ;;  %p192_p3 = pnand %p975_p0, %p191_p2 }
   0x6   : > { %s976_s20 = sshll.u32 (!%p192_p3), %s1255_s12, 5 }
   0x7   : > { %195 = sbr.rel (%p192_p3) target bundleno = 305 (0x131), region = 32  ;;  %p236_p4 = scmp.lt.s32.totalorder (!%p192_p3), %s976_s20, 63 }
   0xc   : > { %v1203_v0 = vld [vmem:[%s1545_s1 + $0x38] sm:$0xff]  ;;  %v318_v1 = vld [vmem:[%s1545_s1 + $0x48] sm:$0x3]  ;;  %vm573_vm0 = vcmask 1040384   ;;  %vm574_vm1 = vcmask 1041408   ;;  %v1202_v3 = vld [vmem:[%s1545_s1 + $0x30] sm:$0xff] }
   0xd   : > { %v504_v2 = vunpack.c.l.b16 %v318_v1  ;;  %580 = vmatpush.bf16.msra.mxu0 %v1203_v0  ;;  %1205 = vmatpush.bf16.msra.mxu2 %v1203_v0  ;;  %v1265_v4 = vmov 65535   ;;  %s1553_s20 = smov (!%p236_p4, %s976_s20), 63  ;;  %v1201_v9 = vld [vmem:[%s1545_s1 + $0x28] sm:$0xff]  ;;  %v1204_v10 = vld [vmem:[%s1545_s1 + $0x40] sm:$0xff]  ;;  %vm524_vm2 = vcmask 154624   ;;  %v1199_v18 = vld [vmem:[%s1545_s1 + $0x18] sm:$0xff] }
   0xe   : > { %v575_v5 = vsel %vm573_vm0, 4294967295, %v1265_v4  ;;  %s1163_s25 = sshll.u32 %s1553_s20, 3  ;;  %v1200_v14 = vld [vmem:[%s1545_s1 + $0x20] sm:$0xff]  ;;  %v1198_v19 = vld [vmem:[%s1545_s1 + $0x10] sm:$0xff]  ;;  %v1197_v20 = vld [vmem:[%s1545_s1 + $0x8] sm:$0xff]  ;;  %s980_s19 = sshll.u32 %s1553_s20, 2 }
   0xf   : > { %v514_v6 = vpack.c.b16 %v504_v2, %v504_v2  ;;  %v576_v7 = vsel %vm574_vm1, %v575_v5, 0  ;;  %s1325_s30 = scalar_lea.vmem %s1544_s0, %s1163_s25  ;;  %v1196_v26 = vld [vmem:[%s1545_s1] sm:$0xff]  ;;  %s1432_s23 = scalar_lea.vmem %s1547_s3, %s980_s19  ;;  %vm822_vm3 = vcmask 60416  }
  0x10   : > { %v1164_v11 = vld [vmem:[%s1325_s30 + $0x4] sm:$0xf]  ;;  %v985_v12 = vld [vmem:[%s1325_s30 + $0x8] sm:$0xf0]  ;;  %v1182_v15 = vld [vmem:[%s1325_s30 + $0x94] sm:$0xf] }
  0x11   : > { %v578_v8 = vand.u32 %v576_v7, %v514_v6  ;;  %581 = vmatpush.bf16.msra.mxu0 %v1202_v3  ;;  %1206 = vmatpush.bf16.msra.mxu2 %v1202_v3  ;;  %v988_v13 = vor.u32 %v1164_v11, %v985_v12  ;;  %v1057_v16 = vld [vmem:[%s1325_s30 + $0x98] sm:$0xf0]  ;;  %v1166_v21 = vld [vmem:[%s1325_s30 + $0x14] sm:$0xf]  ;;  %v1184_v23 = vld [vmem:[%s1325_s30 + $0xa4] sm:$0xf] }
  0x12   : > { %v1060_v17 = vor.u32 %v1182_v15, %v1057_v16  ;;  %v993_v22 = vld [vmem:[%s1325_s30 + $0x18] sm:$0xf0]  ;;  %v1065_v24 = vld [vmem:[%s1325_s30 + $0xa8] sm:$0xf0]  ;;  %v983_v27 = vld [vmem:[%s1325_s30] sm:$0xf] }
  0x13   : > { %675 = vmatpush.bf16.msra.mxu1 %v578_v8  ;;  %1213 = vmatpush.bf16.msra.mxu3 %v578_v8  ;;  %v996_v25 = vor.u32 %v1166_v21, %v993_v22  ;;  %v1165_v28 = vld [vmem:[%s1325_s30 + $0x4] sm:$0xf0]  ;;  %v1047_v29 = vld [vmem:[%s1325_s30 + $0x80] sm:$0xf]  ;;  %v1068_v31 = vor.u32 %v1184_v23, %v1065_v24  ;;  %v1168_v34 = vld [vmem:[%s1325_s30 + $0x24] sm:$0xf] }
  0x14   : > { %v1181_v30 = vld [vmem:[%s1325_s30 + $0x84] sm:$0xf0]  ;;  %v984_v32 = vor.u32 %v1165_v28, %v983_v27  ;;  %v1001_v35 = vld [vmem:[%s1325_s30 + $0x28] sm:$0xf0]  ;;  %v1186_v36 = vld [vmem:[%s1325_s30 + $0xb4] sm:$0xf] }
  0x15   : > { %582 = vmatpush.bf16.msra.mxu0 %v1201_v9  ;;  %1207 = vmatpush.bf16.msra.mxu2 %v1201_v9  ;;  %v1048_v33 = vor.u32 %v1181_v30, %v1047_v29  ;;  %v1073_v37 = vld [vmem:[%s1325_s30 + $0xb8] sm:$0xf0]  ;;  %v1004_v38 = vor.u32 %v1168_v34, %v1001_v35  ;;  %v991_v39 = vld [vmem:[%s1325_s30 + $0x10] sm:$0xf]  ;;  %v1167_v40 = vld [vmem:[%s1325_s30 + $0x14] sm:$0xf0] }
  0x16   : > { %v1055_v41 = vld [vmem:[%s1325_s30 + $0x90] sm:$0xf]  ;;  %v1183_v42 = vld [vmem:[%s1325_s30 + $0x94] sm:$0xf0]  ;;  %v1076_v43 = vor.u32 %v1186_v36, %v1073_v37  ;;  %v992_v44 = vor.u32 %v1167_v40, %v991_v39  ;;  %v1170_v46 = vld [vmem:[%s1325_s30 + $0x34] sm:$0xf] }
  0x17   : > { %676 = vmatpush.bf16.msra.mxu1 %v1204_v10  ;;  %1214 = vmatpush.bf16.msra.mxu3 %v1204_v10  ;;  %v1056_v45 = vor.u32 %v1183_v42, %v1055_v41  ;;  %v1009_v47 = vld [vmem:[%s1325_s30 + $0x38] sm:$0xf0]  ;;  %v1188_v48 = vld [vmem:[%s1325_s30 + $0xc4] sm:$0xf]  ;;  %v1081_v49 = vld [vmem:[%s1325_s30 + $0xc8] sm:$0xf0] }
  0x18   : > { %v1012_v50 = vor.u32 %v1170_v46, %v1009_v47  ;;  %v999_v51 = vld [vmem:[%s1325_s30 + $0x20] sm:$0xf]  ;;  %v1169_v52 = vld [vmem:[%s1325_s30 + $0x24] sm:$0xf0]  ;;  %v1084_v55 = vor.u32 %v1188_v48, %v1081_v49  ;;  %v1172_v58 = vld [vmem:[%s1325_s30 + $0x44] sm:$0xf] }
  0x19   : > { %583 = vmatpush.bf16.msra.mxu0 %v1200_v14  ;;  %1208 = vmatpush.bf16.msra.mxu2 %v1200_v14  ;;  %v1063_v53 = vld [vmem:[%s1325_s30 + $0xa0] sm:$0xf]  ;;  %v1185_v54 = vld [vmem:[%s1325_s30 + $0xa4] sm:$0xf0]  ;;  %v1000_v56 = vor.u32 %v1169_v52, %v999_v51  ;;  %v1017_v59 = vld [vmem:[%s1325_s30 + $0x48] sm:$0xf0] }
  0x1a   : > { %1145 = vmatmul.msk.bf16.vlgmr.msra.gmra.mxu1 %vm524_vm2, %v988_v13  ;;  %1154 = vmatmul.msk.bf16.vlgmr.msra.gmra.mxu3 %vm524_vm2, %v1060_v17  ;;  %v1064_v57 = vor.u32 %v1185_v54, %v1063_v53  ;;  %v1190_v60 = vld [vmem:[%s1325_s30 + $0xd4] sm:$0xf]  ;;  %v1089_v61 = vld [vmem:[%s1325_s30 + $0xd8] sm:$0xf0]  ;;  %v1020_v62 = vor.u32 %v1172_v58, %v1017_v59  ;;  %v1007_v63 = vld [vmem:[%s1325_s30 + $0x30] sm:$0xf] }
  0x1b   : > { %v1171_v0 = vld [vmem:[%s1325_s30 + $0x34] sm:$0xf0]  ;;  %v1071_v1 = vld [vmem:[%s1325_s30 + $0xb0] sm:$0xf]  ;;  %v1092_v3 = vor.u32 %v1190_v60, %v1089_v61  ;;  %v1174_v6 = vld [vmem:[%s1325_s30 + $0x54] sm:$0xf] }
  0x1c   : > { %v1187_v2 = vld [vmem:[%s1325_s30 + $0xb4] sm:$0xf0]  ;;  %v1008_v4 = vor.u32 %v1171_v0, %v1007_v63  ;;  %v1025_v7 = vld [vmem:[%s1325_s30 + $0x58] sm:$0xf0]  ;;  %v1192_v8 = vld [vmem:[%s1325_s30 + $0xe4] sm:$0xf] }
  0x1d   : > { %584 = vmatpush.bf16.msra.mxu0 %v1199_v18  ;;  %1209 = vmatpush.bf16.msra.mxu2 %v1199_v18  ;;  %v1072_v5 = vor.u32 %v1187_v2, %v1071_v1  ;;  %v1097_v9 = vld [vmem:[%s1325_s30 + $0xe8] sm:$0xf0]  ;;  %v1028_v10 = vor.u32 %v1174_v6, %v1025_v7  ;;  %v1015_v11 = vld [vmem:[%s1325_s30 + $0x40] sm:$0xf]  ;;  %v1173_v12 = vld [vmem:[%s1325_s30 + $0x44] sm:$0xf0] }
  0x1e   : > { %v1079_v13 = vld [vmem:[%s1325_s30 + $0xc0] sm:$0xf]  ;;  %v1189_v14 = vld [vmem:[%s1325_s30 + $0xc4] sm:$0xf0]  ;;  %v1100_v15 = vor.u32 %v1192_v8, %v1097_v9  ;;  %v1016_v16 = vor.u32 %v1173_v12, %v1015_v11  ;;  %v1176_v18 = vld [vmem:[%s1325_s30 + $0x64] sm:$0xf] }
  0x1f   : > { %v1080_v17 = vor.u32 %v1189_v14, %v1079_v13  ;;  %v1105_v21 = vld [vmem:[%s1325_s30 + $0xf8] sm:$0xf0]  ;;  %v1023_v23 = vld [vmem:[%s1325_s30 + $0x50] sm:$0xf]  ;;  %v1175_v24 = vld [vmem:[%s1325_s30 + $0x54] sm:$0xf0] }
  0x20   : > { %v1024_v28 = vor.u32 %v1175_v24, %v1023_v23  ;;  %v1178_v30 = vld [vmem:[%s1325_s30 + $0x74] sm:$0xf]  ;;  %v1177_v34 = vld [vmem:[%s1325_s30 + $0x64] sm:$0xf0]  ;;  %v1095_v35 = vld [vmem:[%s1325_s30 + $0xe0] sm:$0xf] }
  0x21   : > { %585 = vmatpush.bf16.msra.mxu0 %v1198_v19  ;;  %1210 = vmatpush.bf16.msra.mxu2 %v1198_v19  ;;  %v1033_v19 = vld [vmem:[%s1325_s30 + $0x68] sm:$0xf0]  ;;  %v1193_v36 = vld [vmem:[%s1325_s30 + $0xe4] sm:$0xf0]  ;;  %v1180_v39 = vld [vmem:[%s1325_s30 + $0x84] sm:$0xf] }
  0x22   : > { %v1036_v22 = vor.u32 %v1176_v18, %v1033_v19  ;;  %v1049_v40 = vld [vmem:[%s1325_s30 + $0x88] sm:$0xf0]  ;;  %v1039_v42 = vld [vmem:[%s1325_s30 + $0x70] sm:$0xf]  ;;  %v1195_v46 = vld [vmem:[%s1325_s30 + $0xf4] sm:$0xf0] }
  0x23   : > { %v1052_v41 = vor.u32 %v1180_v39, %v1049_v40  ;;  %v1425_v51 = vld [vmem:[%s1546_s2] ss:$0 sm:$0xff] }
  0x25   : > { %586 = vmatpush.bf16.msra.mxu0 %v1197_v20  ;;  %1211 = vmatpush.bf16.msra.mxu2 %v1197_v20  ;;  %v1194_v20 = vld [vmem:[%s1325_s30 + $0xf4] sm:$0xf] }
  0x26   : > { %v1108_v27 = vor.u32 %v1194_v20, %v1105_v21 }
  0x29   : > { %587 = vmatpush.bf16.msra.mxu0 %v1196_v26  ;;  %1212 = vmatpush.bf16.msra.mxu2 %v1196_v26  ;;  %v1191_v26 = vld [vmem:[%s1325_s30 + $0xd4] sm:$0xf0] }
  0x2a   : > { %1146 = vmatmul.msk.bf16.gmra.mxu1 %vm524_vm2, %v996_v25  ;;  %1155 = vmatmul.msk.bf16.gmra.mxu3 %vm524_vm2, %v1068_v31  ;;  %v1087_v25 = vld [vmem:[%s1325_s30 + $0xd0] sm:$0xf]  ;;  %v1041_v31 = vld [vmem:[%s1325_s30 + $0x78] sm:$0xf0] }
  0x2b   : > { %v1088_v29 = vor.u32 %v1191_v26, %v1087_v25 }
  0x2c   : > { %588 = vmatmul.bf16.vlgmr.msra.gmra.mxu0 %v984_v32  ;;  %628 = vmatmul.bf16.vlgmr.msra.gmra.mxu2 %v1048_v33  ;;  %v1044_v32 = vor.u32 %v1178_v30, %v1041_v31  ;;  %v1031_v33 = vld [vmem:[%s1325_s30 + $0x60] sm:$0xf] }
  0x2d   : > { %v1032_v37 = vor.u32 %v1177_v34, %v1031_v33 }
  0x3a   : > { %1147 = vmatmul.msk.bf16.gmra.mxu1 %vm524_vm2, %v1004_v38  ;;  %1156 = vmatmul.msk.bf16.gmra.mxu3 %vm524_vm2, %v1076_v43  ;;  %v1096_v38 = vor.u32 %v1193_v36, %v1095_v35  ;;  %v1179_v43 = vld [vmem:[%s1325_s30 + $0x74] sm:$0xf0] }
  0x3b   : > { %v1040_v47 = vor.u32 %v1179_v43, %v1039_v42 }
  0x3c   : > { %593 = vmatmul.bf16.gmra.mxu0 %v992_v44  ;;  %633 = vmatmul.bf16.gmra.mxu2 %v1056_v45  ;;  %v1103_v45 = vld [vmem:[%s1325_s30 + $0xf0] sm:$0xf] }
  0x3d   : > { %v1104_v48 = vor.u32 %v1195_v46, %v1103_v45 }
  0x4a   : > { %1148 = vmatmul.msk.bf16.gmra.mxu1 %vm524_vm2, %v1012_v50  ;;  %1157 = vmatmul.msk.bf16.gmra.mxu3 %vm524_vm2, %v1084_v55 }
  0x4c   : > { %598 = vmatmul.bf16.gmra.mxu0 %v1000_v56  ;;  %638 = vmatmul.bf16.gmra.mxu2 %v1064_v57 }
  0x5a   : > { %1149 = vmatmul.msk.bf16.gmra.mxu1 %vm524_vm2, %v1020_v62  ;;  %1158 = vmatmul.msk.bf16.gmra.mxu3 %vm524_vm2, %v1092_v3 }
  0x5c   : > { %603 = vmatmul.bf16.gmra.mxu0 %v1008_v4  ;;  %643 = vmatmul.bf16.gmra.mxu2 %v1072_v5 }
  0x6a   : > { %1150 = vmatmul.msk.bf16.gmra.mxu1 %vm524_vm2, %v1028_v10  ;;  %1159 = vmatmul.msk.bf16.gmra.mxu3 %vm524_vm2, %v1100_v15 }
  0x6c   : > { %608 = vmatmul.bf16.gmra.mxu0 %v1016_v16  ;;  %648 = vmatmul.bf16.gmra.mxu2 %v1080_v17 }
  0x7a   : > { %1151 = vmatmul.msk.bf16.gmra.mxu1 %vm524_vm2, %v1036_v22  ;;  %1160 = vmatmul.msk.bf16.gmra.mxu3 %vm524_vm2, %v1108_v27 }
  0x7c   : > { %613 = vmatmul.bf16.gmra.mxu0 %v1024_v28  ;;  %653 = vmatmul.bf16.gmra.mxu2 %v1088_v29 }
  0x8a   : > { %1152 = vmatmul.msk.bf16.gmra.mxu1 %vm524_vm2, %v1044_v32 }
  0x8c   : > { %618 = vmatmul.bf16.gmra.mxu0 %v1032_v37  ;;  %658 = vmatmul.bf16.gmra.mxu2 %v1096_v38 }
  0x97   : > { %v678_v44 = vpop.f32.mrf.mxu1 }
  0x9a   : > { %1153 = vmatmul.msk.bf16.gmra.mxu1 %vm524_vm2, %v1052_v41 }
  0x9c   : > { %623 = vmatmul.bf16.gmra.mxu0 %v1040_v47  ;;  %663 = vmatmul.bf16.gmra.mxu2 %v1104_v48 }
  0x9d   : > { %v723_v52 = vpop.f32.mrf.mxu3 }
  0x9f   : > { %v680_v49 = vpop.f32.mrf.mxu1 }
  0xa5   : > { %v725_v62 = vpop.f32.mrf.mxu3 }
  0xa7   : > { %v683_v50 = vpop.f32.mrf.mxu1 }
  0xa9   : > { %v589_v53 = vpop.f32.mrf.mxu0 }
  0xaa   : > { %v590_v54 = vadd.f32 %v1425_v51, %v589_v53 }
  0xac   : > { %v679_v55 = vadd.f32 %v678_v44, %v590_v54 }
  0xad   : > { %v728_v7 = vpop.f32.mrf.mxu3 }
  0xae   : > { %v758_v56 = vmax.f32 %v679_v55, 0.0 }
  0xaf   : > { %v685_v57 = vpop.f32.mrf.mxu1  ;;  %v1434_v59 = vpop.f32.mrf.mxu2 }
  0xb0   : > { %v790_v58 = vpack.c.bf16 %v758_v56, %v758_v56 }
  0xb1   : > { %v591_v60 = vpop.f32.mrf.mxu0 }
  0xb2   : > { %823 = vst.msk [vmem:[%s1432_s23] sm:$0xf] %vm822_vm3, %v790_v58  ;;  %v592_v61 = vadd.f32 %v1425_v51, %v591_v60 }
  0xb4   : > { %v681_v63 = vadd.f32 %v680_v49, %v592_v61 }
  0xb5   : > { %v730_v20 = vpop.f32.mrf.mxu3 }
  0xb6   : > { %v759_v0 = vmax.f32 %v681_v63, 0.0 }
  0xb7   : > { %v688_v1 = vpop.f32.mrf.mxu1  ;;  %v1439_v3 = vpop.f32.mrf.mxu2 }
  0xb8   : > { %v791_v2 = vpack.c.bf16 %v759_v0, %v759_v0 }
  0xb9   : > { %v594_v4 = vpop.f32.mrf.mxu0 }
  0xba   : > { %824 = vst.msk [vmem:[%s1432_s23 + $0x4] sm:$0xf] %vm822_vm3, %v791_v2  ;;  %v595_v5 = vadd.f32 %v1425_v51, %v594_v4 }
  0xbc   : > { %v684_v6 = vadd.f32 %v683_v50, %v595_v5 }
  0xbd   : > { %v733_v35 = vpop.f32.mrf.mxu3 }
  0xbe   : > { %v760_v8 = vmax.f32 %v684_v6, 0.0 }
  0xbf   : > { %v690_v9 = vpop.f32.mrf.mxu1  ;;  %v634_v11 = vpop.f32.mrf.mxu2 }
  0xc0   : > { %v792_v10 = vpack.c.bf16 %v760_v8, %v760_v8  ;;  %v635_v12 = vadd.f32 %v1425_v51, %v634_v11 }
  0xc1   : > { %v596_v13 = vpop.f32.mrf.mxu0 }
  0xc2   : > { %825 = vst.msk [vmem:[%s1432_s23 + $0x8] sm:$0xf] %vm822_vm3, %v792_v10  ;;  %v597_v14 = vadd.f32 %v1425_v51, %v596_v13  ;;  %v724_v15 = vadd.f32 %v723_v52, %v635_v12 }
  0xc4   : > { %v686_v16 = vadd.f32 %v685_v57, %v597_v14  ;;  %v776_v17 = vmax.f32 %v724_v15, 0.0 }
  0xc5   : > { %v735_v50 = vpop.f32.mrf.mxu3 }
  0xc6   : > { %v761_v18 = vmax.f32 %v686_v16, 0.0  ;;  %v808_v21 = vpack.c.bf16 %v776_v17, %v776_v17 }
  0xc7   : > { %v693_v19 = vpop.f32.mrf.mxu1  ;;  %v636_v23 = vpop.f32.mrf.mxu2 }
  0xc8   : > { %v793_v22 = vpack.c.bf16 %v761_v18, %v761_v18  ;;  %841 = vst.msk [vmem:[%s1432_s23 + $0x48] sm:$0xf] %vm822_vm3, %v808_v21  ;;  %v637_v24 = vadd.f32 %v1425_v51, %v636_v23 }
  0xc9   : > { %v599_v25 = vpop.f32.mrf.mxu0 }
  0xca   : > { %826 = vst.msk [vmem:[%s1432_s23 + $0xc] sm:$0xf] %vm822_vm3, %v793_v22  ;;  %v600_v26 = vadd.f32 %v1425_v51, %v599_v25  ;;  %v726_v27 = vadd.f32 %v725_v62, %v637_v24 }
  0xcc   : > { %v689_v28 = vadd.f32 %v688_v1, %v600_v26  ;;  %v777_v29 = vmax.f32 %v726_v27, 0.0 }
  0xcd   : > { %v738_v2 = vpop.f32.mrf.mxu3 }
  0xce   : > { %v762_v30 = vmax.f32 %v689_v28, 0.0  ;;  %v809_v32 = vpack.c.bf16 %v777_v29, %v777_v29 }
  0xcf   : > { %v695_v31 = vpop.f32.mrf.mxu1  ;;  %v639_v34 = vpop.f32.mrf.mxu2 }
  0xd0   : > { %v794_v33 = vpack.c.bf16 %v762_v30, %v762_v30  ;;  %842 = vst.msk [vmem:[%s1432_s23 + $0x4c] sm:$0xf] %vm822_vm3, %v809_v32  ;;  %v640_v36 = vadd.f32 %v1425_v51, %v639_v34 }
  0xd1   : > { %v601_v37 = vpop.f32.mrf.mxu0 }
  0xd2   : > { %827 = vst.msk [vmem:[%s1432_s23 + $0x10] sm:$0xf] %vm822_vm3, %v794_v33  ;;  %v602_v38 = vadd.f32 %v1425_v51, %v601_v37  ;;  %v729_v39 = vadd.f32 %v728_v7, %v640_v36 }
  0xd4   : > { %v691_v40 = vadd.f32 %v690_v9, %v602_v38  ;;  %v778_v41 = vmax.f32 %v729_v39, 0.0 }
  0xd5   : > { %v740_v18 = vpop.f32.mrf.mxu3 }
  0xd6   : > { %v763_v42 = vmax.f32 %v691_v40, 0.0  ;;  %v810_v44 = vpack.c.bf16 %v778_v41, %v778_v41 }
  0xd7   : > { %v698_v43 = vpop.f32.mrf.mxu1  ;;  %v641_v46 = vpop.f32.mrf.mxu2 }
  0xd8   : > { %v795_v45 = vpack.c.bf16 %v763_v42, %v763_v42  ;;  %843 = vst.msk [vmem:[%s1432_s23 + $0x50] sm:$0xf] %vm822_vm3, %v810_v44  ;;  %v642_v47 = vadd.f32 %v1425_v51, %v641_v46 }
  0xd9   : > { %v604_v48 = vpop.f32.mrf.mxu0 }
  0xda   : > { %828 = vst.msk [vmem:[%s1432_s23 + $0x14] sm:$0xf] %vm822_vm3, %v795_v45  ;;  %v605_v49 = vadd.f32 %v1425_v51, %v604_v48  ;;  %v731_v52 = vadd.f32 %v730_v20, %v642_v47 }
  0xdc   : > { %v694_v53 = vadd.f32 %v693_v19, %v605_v49  ;;  %v779_v54 = vmax.f32 %v731_v52, 0.0 }
  0xdd   : > { %v743_v33 = vpop.f32.mrf.mxu3 }
  0xde   : > { %v764_v55 = vmax.f32 %v694_v53, 0.0  ;;  %v811_v57 = vpack.c.bf16 %v779_v54, %v779_v54 }
  0xdf   : > { %v700_v56 = vpop.f32.mrf.mxu1  ;;  %v644_v60 = vpop.f32.mrf.mxu2 }
  0xe0   : > { %v796_v58 = vpack.c.bf16 %v764_v55, %v764_v55  ;;  %844 = vst.msk [vmem:[%s1432_s23 + $0x54] sm:$0xf] %vm822_vm3, %v811_v57  ;;  %v645_v61 = vadd.f32 %v1425_v51, %v644_v60 }
  0xe1   : > { %v606_v62 = vpop.f32.mrf.mxu0 }
  0xe2   : > { %829 = vst.msk [vmem:[%s1432_s23 + $0x18] sm:$0xf] %vm822_vm3, %v796_v58  ;;  %v607_v63 = vadd.f32 %v1425_v51, %v606_v62  ;;  %v734_v0 = vadd.f32 %v733_v35, %v645_v61 }
  0xe4   : > { %v696_v1 = vadd.f32 %v695_v31, %v607_v63  ;;  %v780_v4 = vmax.f32 %v734_v0, 0.0 }
  0xe5   : > { %v745_v48 = vpop.f32.mrf.mxu3 }
  0xe6   : > { %v765_v5 = vmax.f32 %v696_v1, 0.0  ;;  %v812_v7 = vpack.c.bf16 %v780_v4, %v780_v4 }
  0xe7   : > { %v703_v6 = vpop.f32.mrf.mxu1  ;;  %v646_v9 = vpop.f32.mrf.mxu2 }
  0xe8   : > { %v797_v8 = vpack.c.bf16 %v765_v5, %v765_v5  ;;  %845 = vst.msk [vmem:[%s1432_s23 + $0x58] sm:$0xf] %vm822_vm3, %v812_v7  ;;  %v647_v10 = vadd.f32 %v1425_v51, %v646_v9 }
  0xe9   : > { %v609_v11 = vpop.f32.mrf.mxu0 }
  0xea   : > { %830 = vst.msk [vmem:[%s1432_s23 + $0x1c] sm:$0xf] %vm822_vm3, %v797_v8  ;;  %v610_v12 = vadd.f32 %v1425_v51, %v609_v11  ;;  %v736_v13 = vadd.f32 %v735_v50, %v647_v10 }
  0xec   : > { %v699_v14 = vadd.f32 %v698_v43, %v610_v12  ;;  %v781_v15 = vmax.f32 %v736_v13, 0.0  ;;  %v630_v13 = vadd.f32 %v1425_v51, %v1434_v59 }
  0xed   : > { %v748_v0 = vpop.f32.mrf.mxu3 }
  0xee   : > { %v766_v16 = vmax.f32 %v699_v14, 0.0  ;;  %v813_v19 = vpack.c.bf16 %v781_v15, %v781_v15 }
  0xef   : > { %v705_v17 = vpop.f32.mrf.mxu1  ;;  %v649_v21 = vpop.f32.mrf.mxu2 }
  0xf0   : > { %v798_v20 = vpack.c.bf16 %v766_v16, %v766_v16  ;;  %846 = vst.msk [vmem:[%s1432_s23 + $0x5c] sm:$0xf] %vm822_vm3, %v813_v19  ;;  %v650_v22 = vadd.f32 %v1425_v51, %v649_v21 }
  0xf1   : > { %v611_v23 = vpop.f32.mrf.mxu0 }
  0xf2   : > { %831 = vst.msk [vmem:[%s1432_s23 + $0x20] sm:$0xf] %vm822_vm3, %v798_v20  ;;  %v612_v24 = vadd.f32 %v1425_v51, %v611_v23  ;;  %v739_v25 = vadd.f32 %v738_v2, %v650_v22 }
  0xf4   : > { %v701_v26 = vadd.f32 %v700_v56, %v612_v24  ;;  %v782_v27 = vmax.f32 %v739_v25, 0.0 }
  0xf5   : > { %v750_v16 = vpop.f32.mrf.mxu3 }
  0xf6   : > { %v767_v28 = vmax.f32 %v701_v26, 0.0  ;;  %v814_v30 = vpack.c.bf16 %v782_v27, %v782_v27 }
  0xf7   : > { %v708_v29 = vpop.f32.mrf.mxu1  ;;  %v651_v32 = vpop.f32.mrf.mxu2 }
  0xf8   : > { %v799_v31 = vpack.c.bf16 %v767_v28, %v767_v28  ;;  %847 = vst.msk [vmem:[%s1432_s23 + $0x60] sm:$0xf] %vm822_vm3, %v814_v30  ;;  %v652_v34 = vadd.f32 %v1425_v51, %v651_v32  ;;  %v632_v28 = vadd.f32 %v1425_v51, %v1439_v3 }
  0xf9   : > { %v614_v35 = vpop.f32.mrf.mxu0 }
  0xfa   : > { %832 = vst.msk [vmem:[%s1432_s23 + $0x24] sm:$0xf] %vm822_vm3, %v799_v31  ;;  %v615_v36 = vadd.f32 %v1425_v51, %v614_v35  ;;  %v741_v37 = vadd.f32 %v740_v18, %v652_v34 }
  0xfc   : > { %v704_v38 = vadd.f32 %v703_v6, %v615_v36  ;;  %v783_v39 = vmax.f32 %v741_v37, 0.0 }
  0xfd   : > { %v753_v35 = vpop.f32.mrf.mxu3 }
  0xfe   : > { %v768_v40 = vmax.f32 %v704_v38, 0.0  ;;  %v815_v42 = vpack.c.bf16 %v783_v39, %v783_v39 }
  0xff   : > { %v710_v41 = vpop.f32.mrf.mxu1  ;;  %v654_v44 = vpop.f32.mrf.mxu2 }
 0x100   : > { %v800_v43 = vpack.c.bf16 %v768_v40, %v768_v40  ;;  %848 = vst.msk [vmem:[%s1432_s23 + $0x64] sm:$0xf] %vm822_vm3, %v815_v42  ;;  %v655_v45 = vadd.f32 %v1425_v51, %v654_v44 }
 0x101   : > { %v616_v46 = vpop.f32.mrf.mxu0 }
 0x102   : > { %833 = vst.msk [vmem:[%s1432_s23 + $0x28] sm:$0xf] %vm822_vm3, %v800_v43  ;;  %v617_v47 = vadd.f32 %v1425_v51, %v616_v46  ;;  %v744_v49 = vadd.f32 %v743_v33, %v655_v45 }
 0x104   : > { %v706_v50 = vadd.f32 %v705_v17, %v617_v47  ;;  %v784_v52 = vmax.f32 %v744_v49, 0.0 }
 0x105   : > { %v755_v49 = vpop.f32.mrf.mxu3 }
 0x106   : > { %v769_v53 = vmax.f32 %v706_v50, 0.0  ;;  %v816_v55 = vpack.c.bf16 %v784_v52, %v784_v52 }
 0x107   : > { %v713_v54 = vpop.f32.mrf.mxu1  ;;  %v656_v57 = vpop.f32.mrf.mxu2 }
 0x108   : > { %v801_v56 = vpack.c.bf16 %v769_v53, %v769_v53  ;;  %849 = vst.msk [vmem:[%s1432_s23 + $0x68] sm:$0xf] %vm822_vm3, %v816_v55  ;;  %v657_v58 = vadd.f32 %v1425_v51, %v656_v57 }
 0x109   : > { %v619_v60 = vpop.f32.mrf.mxu0 }
 0x10a   : > { %834 = vst.msk [vmem:[%s1432_s23 + $0x2c] sm:$0xf] %vm822_vm3, %v801_v56  ;;  %v620_v61 = vadd.f32 %v1425_v51, %v619_v60  ;;  %v746_v62 = vadd.f32 %v745_v48, %v657_v58 }
 0x10c   : > { %v709_v63 = vadd.f32 %v708_v29, %v620_v61  ;;  %v785_v1 = vmax.f32 %v746_v62, 0.0 }
 0x10e   : > { %v770_v2 = vmax.f32 %v709_v63, 0.0  ;;  %v817_v5 = vpack.c.bf16 %v785_v1, %v785_v1 }
 0x10f   : > { %v715_v4 = vpop.f32.mrf.mxu1  ;;  %v659_v7 = vpop.f32.mrf.mxu2 }
 0x110   : > { %v802_v6 = vpack.c.bf16 %v770_v2, %v770_v2  ;;  %850 = vst.msk [vmem:[%s1432_s23 + $0x6c] sm:$0xf] %vm822_vm3, %v817_v5  ;;  %v660_v8 = vadd.f32 %v1425_v51, %v659_v7 }
 0x111   : > { %v621_v9 = vpop.f32.mrf.mxu0 }
 0x112   : > { %835 = vst.msk [vmem:[%s1432_s23 + $0x30] sm:$0xf] %vm822_vm3, %v802_v6  ;;  %v622_v10 = vadd.f32 %v1425_v51, %v621_v9  ;;  %v749_v11 = vadd.f32 %v748_v0, %v660_v8 }
 0x114   : > { %v711_v12 = vadd.f32 %v710_v41, %v622_v10  ;;  %v786_v14 = vmax.f32 %v749_v11, 0.0 }
 0x116   : > { %v771_v15 = vmax.f32 %v711_v12, 0.0  ;;  %v818_v18 = vpack.c.bf16 %v786_v14, %v786_v14 }
 0x117   : > { %v718_v17 = vpop.f32.mrf.mxu1  ;;  %v661_v21 = vpop.f32.mrf.mxu2 }
 0x118   : > { %v719_v19 = vadd.f32 %v718_v17, %v630_v13  ;;  %v803_v20 = vpack.c.bf16 %v771_v15, %v771_v15  ;;  %851 = vst.msk [vmem:[%s1432_s23 + $0x70] sm:$0xf] %vm822_vm3, %v818_v18  ;;  %v662_v23 = vadd.f32 %v1425_v51, %v661_v21 }
 0x119   : > { %v624_v24 = vpop.f32.mrf.mxu0 }
 0x11a   : > { %v774_v22 = vmax.f32 %v719_v19, 0.0  ;;  %836 = vst.msk [vmem:[%s1432_s23 + $0x34] sm:$0xf] %vm822_vm3, %v803_v20  ;;  %v625_v59 = vadd.f32 %v1425_v51, %v624_v24  ;;  %v751_v26 = vadd.f32 %v750_v16, %v662_v23 }
 0x11c   : > { %v806_v25 = vpack.c.bf16 %v774_v22, %v774_v22  ;;  %v714_v27 = vadd.f32 %v713_v54, %v625_v59  ;;  %v787_v29 = vmax.f32 %v751_v26, 0.0 }
 0x11e   : > { %839 = vst.msk [vmem:[%s1432_s23 + $0x40] sm:$0xf] %vm822_vm3, %v806_v25  ;;  %v772_v30 = vmax.f32 %v714_v27, 0.0  ;;  %v819_v32 = vpack.c.bf16 %v787_v29, %v787_v29 }
 0x11f   : > { %v720_v31 = vpop.f32.mrf.mxu1  ;;  %v664_v36 = vpop.f32.mrf.mxu2 }
 0x120   : > { %v721_v33 = vadd.f32 %v720_v31, %v632_v28  ;;  %v804_v34 = vpack.c.bf16 %v772_v30, %v772_v30  ;;  %852 = vst.msk [vmem:[%s1432_s23 + $0x74] sm:$0xf] %vm822_vm3, %v819_v32  ;;  %v665_v38 = vadd.f32 %v1425_v51, %v664_v36 }
 0x121   : > { %v626_v39 = vpop.f32.mrf.mxu0 }
 0x122   : > { %v775_v37 = vmax.f32 %v721_v33, 0.0  ;;  %837 = vst.msk [vmem:[%s1432_s23 + $0x38] sm:$0xf] %vm822_vm3, %v804_v34  ;;  %v627_v3 = vadd.f32 %v1425_v51, %v626_v39  ;;  %v754_v41 = vadd.f32 %v753_v35, %v665_v38 }
 0x124   : > { %v807_v40 = vpack.c.bf16 %v775_v37, %v775_v37  ;;  %v716_v42 = vadd.f32 %v715_v4, %v627_v3  ;;  %v788_v43 = vmax.f32 %v754_v41, 0.0 }
 0x126   : > { %840 = vst.msk [vmem:[%s1432_s23 + $0x44] sm:$0xf] %vm822_vm3, %v807_v40  ;;  %v773_v44 = vmax.f32 %v716_v42, 0.0  ;;  %v820_v45 = vpack.c.bf16 %v788_v43, %v788_v43 }
 0x127   : > { %v666_v47 = vpop.f32.mrf.mxu2 }
 0x128   : > { %v805_v46 = vpack.c.bf16 %v773_v44, %v773_v44  ;;  %853 = vst.msk [vmem:[%s1432_s23 + $0x78] sm:$0xf] %vm822_vm3, %v820_v45  ;;  %v667_v48 = vadd.f32 %v1425_v51, %v666_v47 }
 0x12a   : > { %838 = vst.msk [vmem:[%s1432_s23 + $0x3c] sm:$0xf] %vm822_vm3, %v805_v46  ;;  %v756_v50 = vadd.f32 %v755_v49, %v667_v48 }
 0x12c   : > { %v789_v52 = vmax.f32 %v756_v50, 0.0 }
 0x12e   : > { %v821_v53 = vpack.c.bf16 %v789_v52, %v789_v52 }
 0x130   : > { %854 = vst.msk [vmem:[%s1432_s23 + $0x7c] sm:$0xf] %vm822_vm3, %v821_v53 }
 0x131 PF: > { %s13_s14 = sadd.s32 1, %s1263_s14   ;;  %s1548_s12 = smov %s1259_s13 }
 0x132   : > { %p10_p5 = scmp.ge.s32.totalorder %s13_s14, 4   ;;  %s1549_s13 = smov %s1551_s15 }
 0x134   :  { %12 = sbr.rel (!%p10_p5) target bundleno = 2 (0x2), region = 68 }

</bundles_post_ra>
